<compile_context>
chip_gen: v7x
topology: tpu7x:2x2x1
jax: 0.10.0
libtpu: 0.0.40
codegen_flags: <defaults>
</compile_context>

<pallas_src>
import jax
import jax.numpy as jnp
from jax.experimental import pallas as pl
from jax.experimental.pallas import tpu as pltpu

EPS = 1e-8
CLIP_VALUE = -30.0
_LOG10 = 2.302585092994046          # ln(10)


def _round_up(x, m):
    return ((x + m - 1) // m) * m


def _tile_and_vmem_limit():
    """Generation-aware per-input tile-byte target and scoped-VMEM request."""
    try:
        vmem_phys = int(pltpu.get_tpu_info().vmem_capacity_bytes)
    except Exception:  # pragma: no cover - conservative fallback if query unavailable
        vmem_phys = 128 << 20
    if vmem_phys <= (64 << 20):
        # v7x: 64 MiB per-TC VMEM, ~3.2 TB/s HBM -> bigger tiles amortize per-step overhead.
        tile = 4 << 20
    else:
        # v5e / v6e (128 MiB physical VMEM): 2 MiB/input already sits near HBM roofline.
        tile = 2 << 20
    # 2 inputs x 2 pipeline buffers x tile, plus headroom for output + compiler scratch.
    limit = min(4 * tile + (8 << 20), max(vmem_phys - (16 << 20), 16 << 20))
    return tile, limit


def _sdsdr_rows_kernel(est_ref, tgt_ref, sdr_ref):
    # est_ref / tgt_ref: (R, T) VMEM tiles; each row is one (batch, source) pair.
    est = est_ref[...].astype(jnp.float32)
    tgt = tgt_ref[...].astype(jnp.float32)
    inv_t = 1.0 / float(est.shape[-1])

    # Single fused pass over the raw tile: five running sums, no centered copies.
    sum_e = jnp.sum(est, axis=-1, keepdims=True)             # (R, 1)
    sum_t = jnp.sum(tgt, axis=-1, keepdims=True)             # (R, 1)
    sum_et = jnp.sum(est * tgt, axis=-1, keepdims=True)      # (R, 1)
    sum_tt = jnp.sum(tgt * tgt, axis=-1, keepdims=True)      # (R, 1)
    sum_ee = jnp.sum(est * est, axis=-1, keepdims=True)      # (R, 1)

    # Zero-mean corrections (zero_mean=True in MultiSrcNegSDR), all (R, 1) scalar math.
    dot = sum_et - sum_e * sum_t * inv_t                     # <est_c, tgt_c>
    t_energy = sum_tt - sum_t * sum_t * inv_t                # ||tgt_c||^2
    e_energy = sum_ee - sum_e * sum_e * inv_t                # ||est_c||^2
    s_energy = t_energy + EPS

    # sum(scaled_targets^2) without materializing scaled_targets:
    #   scaled = dot * tgt_c / s_energy  =>  sum(scaled^2) = dot^2 * t_energy / s_energy^2
    num = dot * dot * t_energy / (s_energy * s_energy)
    # ||est_c - tgt_c||^2 = ||est_c||^2 - 2<est_c,tgt_c> + ||tgt_c||^2
    den = e_energy - 2.0 * dot + t_energy + EPS

    sdr_ref[...] = (10.0 / _LOG10) * jnp.log(num / den + EPS)   # per-row SD-SDR in dB


def clipped_sdr(est_targets, targets):
    """est_targets, targets: (B, n_src, T) -> (B,) float32 clipped SD-SDR loss."""
    B, S, T = est_targets.shape
    n_rows = B * S
    est2 = est_targets.reshape(n_rows, T)
    tgt2 = targets.reshape(n_rows, T)

    itemsize = jnp.dtype(est_targets.dtype).itemsize
    sub = 8 if itemsize >= 4 else 16                 # sublane packing granularity

    tile_bytes, vmem_limit = _tile_and_vmem_limit()
    row_bytes = max(1, T * itemsize)
    cap = max(sub, (tile_bytes // row_bytes) // sub * sub)
    block_rows = min(cap, _round_up(n_rows, sub))

    # Prefer >= 4 grid steps (>= 2 per v7x TensorCore) when enough rows exist, so DMA
    # prefetch overlaps compute on every core.
    if n_rows >= 4 * sub:
        block_rows = min(block_rows, max(sub, (n_rows // 4) // sub * sub))

    grid = (pl.cdiv(n_rows, block_rows),)            # ragged edge block is masked by Pallas

    sdr_rows = pl.pallas_call(
        _sdsdr_rows_kernel,
        out_shape=jax.ShapeDtypeStruct((n_rows, 1), jnp.float32),
        grid_spec=pltpu.PrefetchScalarGridSpec(
            num_scalar_prefetch=0,
            grid=grid,
            in_specs=[
                pl.BlockSpec((block_rows, T), lambda i: (i, 0)),
                pl.BlockSpec((block_rows, T), lambda i: (i, 0)),
            ],
            out_specs=pl.BlockSpec((block_rows, 1), lambda i: (i, 0)),
        ),
        compiler_params=pltpu.CompilerParams(
            dimension_semantics=("parallel",),
            vmem_limit_bytes=vmem_limit),
    )(est2, tgt2)

    sdr = sdr_rows[:, 0].reshape(B, S)
    loss = -jnp.mean(sdr, axis=-1)                   # MultiSrcNegSDR: negative mean over sources
    return jnp.maximum(loss, CLIP_VALUE)             # clamp(min=clip_value)


def clipped_sdr_ref(est_targets, targets):
    """Pure-JAX reference mirroring MultiSrcNegSDR('sdsdr') + clamp(min=-30)."""
    est = est_targets - jnp.mean(est_targets, axis=2, keepdims=True)
    tgt = targets - jnp.mean(targets, axis=2, keepdims=True)
    dot = jnp.sum(est * tgt, axis=2, keepdims=True)
    s_energy = jnp.sum(tgt ** 2, axis=2, keepdims=True) + EPS
    scaled = dot * tgt / s_energy
    e_noise = est - tgt
    sdr = jnp.sum(scaled ** 2, axis=2) / (jnp.sum(e_noise ** 2, axis=2) + EPS)
    sdr = 10.0 * jnp.log10(sdr + EPS)
    return jnp.maximum(-jnp.mean(sdr, axis=-1), CLIP_VALUE)


if __name__ == "__main__":
    key = jax.random.PRNGKey(0)
    k = jax.random.split(key, 8)

    # Case 1: canonical small shape (rows exactly fill one 8-sublane block).
    B, S, T = 2, 4, 128
    targets = jax.random.normal(k[0], (B, S, T), dtype=jnp.float32)
    est_targets = targets + 0.3 * jax.random.normal(k[1], (B, S, T), dtype=jnp.float32)
    out = jax.block_until_ready(clipped_sdr(est_targets, targets))
    ref = clipped_sdr_ref(est_targets, targets)
    assert out.shape == (B,)
    assert jnp.allclose(out, ref, atol=1e-4, rtol=1e-4), (out, ref)

    # Case 2: ragged edge block (n_rows=9 < block_rows) and T not a multiple of 128 — no jnp.pad.
    B2, S2, T2 = 3, 3, 96
    targets2 = jax.random.normal(k[2], (B2, S2, T2), dtype=jnp.float32)
    est_targets2 = targets2 + 0.5 * jax.random.normal(k[3], (B2, S2, T2), dtype=jnp.float32)
    out2 = jax.block_until_ready(clipped_sdr(est_targets2, targets2))
    ref2 = clipped_sdr_ref(est_targets2, targets2)
    assert out2.shape == (B2,)
    assert jnp.allclose(out2, ref2, atol=1e-4, rtol=1e-4), (out2, ref2)

    # Case 3: multi-step parallel grid with a ragged last block (n_rows=42 -> 6 steps of 8 rows).
    B3, S3, T3 = 7, 6, 160
    targets3 = jax.random.normal(k[4], (B3, S3, T3), dtype=jnp.float32)
    est_targets3 = targets3 + 0.2 * jax.random.normal(k[5], (B3, S3, T3), dtype=jnp.float32)
    out3 = jax.block_until_ready(clipped_sdr(est_targets3, targets3))
    ref3 = clipped_sdr_ref(est_targets3, targets3)
    assert out3.shape == (B3,)
    assert jnp.allclose(out3, ref3, atol=1e-4, rtol=1e-4), (out3, ref3)

    # Case 4: DC offset bounds the raw-moment cancellation error (per correctness review).
    B4, S4, T4 = 2, 2, 256
    targets4 = 3.0 + jax.random.normal(k[6], (B4, S4, T4), dtype=jnp.float32)
    est_targets4 = targets4 + 0.4 * jax.random.normal(k[7], (B4, S4, T4), dtype=jnp.float32)
    out4 = jax.block_until_ready(clipped_sdr(est_targets4, targets4))
    ref4 = clipped_sdr_ref(est_targets4, targets4)
    assert out4.shape == (B4,)
    assert jnp.allclose(out4, ref4, atol=1e-3, rtol=1e-3), (out4, ref4)

    print("KERNEL_OK")
</pallas_src>

<mosaic_0001>
module attributes {stable_mosaic.version = 11 : i64} {
  func.func @_sdsdr_rows_kernel(%arg0: i32, %arg1: memref<8x128xf32, #tpu.memory_space<vmem>>, %arg2: memref<8x128xf32, #tpu.memory_space<vmem>>, %arg3: memref<8x1xf32, #tpu.memory_space<vmem>>) attributes {dimension_semantics = [#tpu.dimension_semantics<parallel>], iteration_bounds = array<i64: 1>, scalar_prefetch = 0 : i64, scratch_operands = 0 : i64, tpu.core_type = #tpu.core_type<tc>, window_params = [{transform_indices = @transform_0, window_bounds = array<i64: 8, 128>}, {transform_indices = @transform_1, window_bounds = array<i64: 8, 128>}, {transform_indices = @transform_2, window_bounds = array<i64: 8, 1>}]} {
    %c0 = arith.constant 0 : index
    %c0_0 = arith.constant 0 : index
    %0 = vector.load %arg1[%c0, %c0_0] : memref<8x128xf32, #tpu.memory_space<vmem>>, vector<8x128xf32>
    %c0_1 = arith.constant 0 : index
    %c0_2 = arith.constant 0 : index
    %1 = vector.load %arg2[%c0_1, %c0_2] : memref<8x128xf32, #tpu.memory_space<vmem>>, vector<8x128xf32>
    %cst = arith.constant dense<0.000000e+00> : vector<8xf32>
    %2 = vector.multi_reduction <add>, %0, %cst [1] : vector<8x128xf32> to vector<8xf32>
    %3 = vector.shape_cast %2 : vector<8xf32> to vector<8x1xf32>
    %cst_3 = arith.constant dense<0.000000e+00> : vector<8xf32>
    %4 = vector.multi_reduction <add>, %1, %cst_3 [1] : vector<8x128xf32> to vector<8xf32>
    %5 = vector.shape_cast %4 : vector<8xf32> to vector<8x1xf32>
    %6 = arith.mulf %0, %1 : vector<8x128xf32>
    %cst_4 = arith.constant dense<0.000000e+00> : vector<8xf32>
    %7 = vector.multi_reduction <add>, %6, %cst_4 [1] : vector<8x128xf32> to vector<8xf32>
    %8 = vector.shape_cast %7 : vector<8xf32> to vector<8x1xf32>
    %9 = arith.mulf %1, %1 : vector<8x128xf32>
    %cst_5 = arith.constant dense<0.000000e+00> : vector<8xf32>
    %10 = vector.multi_reduction <add>, %9, %cst_5 [1] : vector<8x128xf32> to vector<8xf32>
    %11 = vector.shape_cast %10 : vector<8xf32> to vector<8x1xf32>
    %12 = arith.mulf %0, %0 : vector<8x128xf32>
    %cst_6 = arith.constant dense<0.000000e+00> : vector<8xf32>
    %13 = vector.multi_reduction <add>, %12, %cst_6 [1] : vector<8x128xf32> to vector<8xf32>
    %14 = vector.shape_cast %13 : vector<8xf32> to vector<8x1xf32>
    %15 = arith.mulf %3, %5 : vector<8x1xf32>
    %cst_7 = arith.constant 7.812500e-03 : f32
    %16 = vector.broadcast %cst_7 : f32 to vector<8x1xf32>
    %17 = arith.mulf %15, %16 : vector<8x1xf32>
    %18 = arith.subf %8, %17 : vector<8x1xf32>
    %19 = arith.mulf %5, %5 : vector<8x1xf32>
    %cst_8 = arith.constant 7.812500e-03 : f32
    %20 = vector.broadcast %cst_8 : f32 to vector<8x1xf32>
    %21 = arith.mulf %19, %20 : vector<8x1xf32>
    %22 = arith.subf %11, %21 : vector<8x1xf32>
    %23 = arith.mulf %3, %3 : vector<8x1xf32>
    %cst_9 = arith.constant 7.812500e-03 : f32
    %24 = vector.broadcast %cst_9 : f32 to vector<8x1xf32>
    %25 = arith.mulf %23, %24 : vector<8x1xf32>
    %26 = arith.subf %14, %25 : vector<8x1xf32>
    %cst_10 = arith.constant 9.99999993E-9 : f32
    %27 = vector.broadcast %cst_10 : f32 to vector<8x1xf32>
    %28 = arith.addf %22, %27 : vector<8x1xf32>
    %29 = arith.mulf %18, %18 : vector<8x1xf32>
    %30 = arith.mulf %29, %22 : vector<8x1xf32>
    %31 = arith.mulf %28, %28 : vector<8x1xf32>
    %32 = arith.divf %30, %31 : vector<8x1xf32>
    %cst_11 = arith.constant 2.000000e+00 : f32
    %33 = vector.broadcast %cst_11 : f32 to vector<8x1xf32>
    %34 = arith.mulf %33, %18 : vector<8x1xf32>
    %35 = arith.subf %26, %34 : vector<8x1xf32>
    %36 = arith.addf %35, %22 : vector<8x1xf32>
    %cst_12 = arith.constant 9.99999993E-9 : f32
    %37 = vector.broadcast %cst_12 : f32 to vector<8x1xf32>
    %38 = arith.addf %36, %37 : vector<8x1xf32>
    %39 = arith.divf %32, %38 : vector<8x1xf32>
    %cst_13 = arith.constant 9.99999993E-9 : f32
    %40 = vector.broadcast %cst_13 : f32 to vector<8x1xf32>
    %41 = arith.addf %39, %40 : vector<8x1xf32>
    %42 = math.log %41 : vector<8x1xf32>
    %cst_14 = arith.constant 4.34294462 : f32
    %43 = vector.broadcast %cst_14 : f32 to vector<8x1xf32>
    %44 = arith.mulf %43, %42 : vector<8x1xf32>
    %c0_15 = arith.constant 0 : index
    %c0_16 = arith.constant 0 : index
    %45 = vector.load %arg3[%c0_15, %c0_16] : memref<8x1xf32, #tpu.memory_space<vmem>>, vector<8x1xf32>
    tpu.vector_store %arg3[%c0_15, %c0_16], %44 {strides = array<i32>} : memref<8x1xf32, #tpu.memory_space<vmem>>, vector<8x1xf32>,
    return
  }
  func.func @transform_0(%arg0: i32) -> (i32, i32) {
    %c0_i32 = arith.constant 0 : i32
    %c0_i32_0 = arith.constant 0 : i32
    return %arg0, %c0_i32 : i32, i32
  }
  func.func @transform_1(%arg0: i32) -> (i32, i32) {
    %c0_i32 = arith.constant 0 : i32
    %c0_i32_0 = arith.constant 0 : i32
    return %arg0, %c0_i32 : i32, i32
  }
  func.func @transform_2(%arg0: i32) -> (i32, i32) {
    %c0_i32 = arith.constant 0 : i32
    %c0_i32_0 = arith.constant 0 : i32
    return %arg0, %c0_i32 : i32, i32
  }
}

</mosaic_0001>

<bundles_post_ra>
// kernel: tpu_custom_call.1
= control target key start
LH: loop header
LB: loop body
LE: loop exit
PB: predicated region body
PF: predicated region fallthrough
CT: control target
= control target key end

     0   :  { %7 = vsyncpa [#allocation3], 0  ;;  %s183_s0 = inlined_call_operand.hbm [shape: f32[8,128], index: 0, kind: input, shape index: {}]   ;;  %s184_s1 = inlined_call_operand.hbm [shape: f32[8,128], index: 1, kind: input, shape index: {}]   ;;  %s185_s2 = inlined_call_operand.vmem [shape: f32[8,1], index: 2, kind: output, shape index: {}]  }
   0x1   :  { %8 = vsyncpa [#allocation5], 0  ;;  %s139_s9 = smov [#allocation2]   ;;  %s140_s11 = smov [#allocation4]  }
   0x2   :  { %s15_s10 = sshll.u32 %s139_s9, 4  ;;  %s25_s12 = sshll.u32 %s140_s11, 4  ;;  %s16_s10 = int_to_ptr.vmem [resolvable:$true] %s15_s10  ;;  %s26_s12 = int_to_ptr.vmem [resolvable:$true] %s25_s12 }
   0x3   :  { %s91_s15 = scalar_lea.hbm %s183_s0, 128 }
   0x4   :  { %p92_p0 = scmp.ne.s32.totalorder %s183_s0, %s91_s15  ;;  %p95_p1 = scmp.lt.u32.totalorder %s91_s15, %s183_s0 }
   0x6   :  { %p97_p2 = pnand %p95_p1, %p92_p0 }
   0x8   :  { %100 = shalt.err (!%p97_p2)
}
   0x9   :  { %s101_s20 = scalar_lea.vmem %s16_s10, 128  ;;  %p106_p4 = scmp.lt.s32.totalorder %s16_s10, %s16_s10 }
   0xa   :  { %p102_p3 = scmp.ne.s32.totalorder %s16_s10, %s101_s20  ;;  %p107_p5 = scmp.lt.s32.totalorder %s101_s20, %s101_s20 }
   0xc   :  { %p108_p6 = por %p107_p5, %p106_p4 }
   0xe   :  { %p109_p7 = pnand %p108_p6, %p102_p3 }
  0x10   :  { %112 = shalt.err (!%p109_p7)
}
  0x11   :  { %18 = dma.hbm_to_vmem [thread:$0]  %s183_s0, 128, %s16_s10, [#allocation3]  }
  0x12   :  { %s113_s25 = scalar_lea.hbm %s184_s1, 128 }
  0x13   :  { %p114_p8 = scmp.ne.s32.totalorder %s184_s1, %s113_s25  ;;  %p117_p9 = scmp.lt.u32.totalorder %s113_s25, %s184_s1 }
  0x15   :  { %p119_p10 = pnand %p117_p9, %p114_p8 }
  0x17   :  { %122 = shalt.err (!%p119_p10)
}
  0x18   :  { %s123_s30 = scalar_lea.vmem %s26_s12, 128  ;;  %p128_p12 = scmp.lt.s32.totalorder %s26_s12, %s26_s12 }
  0x19   :  { %p124_p11 = scmp.ne.s32.totalorder %s26_s12, %s123_s30  ;;  %p129_p13 = scmp.lt.s32.totalorder %s123_s30, %s123_s30 }
  0x1b   :  { %p130_p0 = por %p129_p13, %p128_p12 }
  0x1d   :  { %p131_p1 = pnand %p130_p0, %p124_p11 }
  0x1f   :  { %134 = shalt.err (!%p131_p1)
}
  0x20   :  { %28 = dma.hbm_to_vmem [thread:$0]  %s184_s1, 128, %s26_s12, [#allocation5]  }
  0x21   :  { %135 = dma.done.wait [#allocation3], 128  }
  0x22   :  { %136 = vsyncadd [#allocation3], 4294967168 }
  0x23   :  { %137 = dma.done.wait [#allocation5], 128  }
  0x24   :  { %138 = vsyncadd [#allocation5], 4294967168  ;;  %v35_v0 = vld [vmem:[#allocation2] sm:$0xff]  ;;  %v36_v1 = vld [vmem:[#allocation4] sm:$0xff]  ;;  %vm75_vm0 = vcmask 7168  }
  0x25   :  { %37 = vadd.xlane.f32.xlu0 %v35_v0  ;;  %v41_v2 = vmul.f32 %v36_v1, %v35_v0  ;;  %v44_v3 = vmul.f32 %v36_v1, %v36_v1  ;;  %v47_v4 = vmul.f32 %v35_v0, %v35_v0 }
  0x27   :  { %42 = vadd.xlane.f32.xlu1 %v41_v2 }
  0x29   :  { %39 = vadd.xlane.f32.xlu0 %v36_v1 }
  0x2b   :  { %45 = vadd.xlane.f32.xlu1 %v44_v3 }
  0x2d   :  { %48 = vadd.xlane.f32.xlu0 %v47_v4 }
  0xb2   :  { %v38_v5 = vpop.xlane.xlu0 %37 }
  0xb3   :  { %v56_v8 = vmul.f32 %v38_v5, %v38_v5 }
  0xb4   :  { %v43_v6 = vpop.xlane.xlu1 %42 }
  0xb5   :  { %v57_v15 = vmul.f32 0.0078125, %v56_v8 }
  0xb6   :  { %v40_v7 = vpop.xlane.xlu0 %39 }
  0xb7   :  { %v50_v9 = vmul.f32 %v40_v7, %v38_v5  ;;  %v53_v10 = vmul.f32 %v40_v7, %v40_v7 }
  0xb8   :  { %v46_v11 = vpop.xlane.xlu1 %45 }
  0xb9   :  { %v51_v12 = vmul.f32 0.0078125, %v50_v9  ;;  %v54_v13 = vmul.f32 0.0078125, %v53_v10 }
  0xba   :  { %v49_v14 = vpop.xlane.xlu0 %48 }
  0xbb   :  { %v52_v16 = vsub.f32 %v43_v6, %v51_v12  ;;  %v55_v17 = vsub.f32 %v46_v11, %v54_v13  ;;  %v58_v19 = vsub.f32 %v49_v14, %v57_v15 }
  0xbd   :  { %v65_v18 = vmul.f32 2.0, %v52_v16  ;;  %v59_v20 = vadd.f32 1e-08, %v55_v17  ;;  %v60_v25 = vmul.f32 %v52_v16, %v52_v16 }
  0xbf   :  { %v66_v21 = vsub.f32 %v58_v19, %v65_v18  ;;  %v62_v22 = vmul.f32 %v59_v20, %v59_v20  ;;  %v61_v27 = vmul.f32 %v60_v25, %v55_v17 }
  0xc1   :  { %85 = vrcp.f32 %v62_v22  ;;  %v67_v23 = vadd.f32 %v66_v21, %v55_v17 }
  0xc3   :  { %v68_v24 = vadd.f32 1e-08, %v67_v23 }
  0xc5   :  { %87 = vrcp.f32 %v68_v24 }
  0xcb   :  { %v86_v26 = vpop.eup %85 }
  0xcc   :  { %v64_v28 = vmul.f32 %v86_v26, %v61_v27 }
  0xcf   :  { %v88_v29 = vpop.eup %87 }
  0xd0   :  { %v70_v30 = vmul.f32 %v88_v29, %v64_v28 }
  0xd2   :  { %v71_v31 = vadd.f32 1e-08, %v70_v30 }
  0xd4   :  { %89 = vlog2.f32 %v71_v31 }
  0xde   :  { %v90_v32 = vpop.eup %89 }
  0xdf   :  { %v73_v33 = vmul.f32 0.6931472, %v90_v32 }
  0xe1   :  { %v74_v34 = vmul.f32 4.3429446, %v73_v33 }
  0xe3   :  { %76 = vst.msk [vmem:[%s185_s2] sm:$0xff] %vm75_vm0, %v74_v34 }
  0xe4   :  { %81 = vsyncpa [#allocation3], 1 }
  0xe5   :  { %82 = vsyncpa [#allocation5], 1 }

</bundles_post_ra>
